<compile_context>
chip_gen: v6e
topology: v6e:2x2x1
jax: 0.10.0
libtpu: 0.0.40
codegen_flags: <defaults>
</compile_context>

<pallas_src>
import functools

import jax
import jax.numpy as jnp
from jax.experimental import pallas as pl
from jax.experimental.pallas import tpu as pltpu

EPS = 8.0 / 255.0


def _adv_kernel(x_ref, p_ref, o_ref, *, eps):
    # x_ref: (TB, D), p_ref: (1, D) -> sublane-broadcast over the batch tile.
    o_ref[...] = x_ref[...] + p_ref[...] * eps


def _pick_batch_tile(B, batch_tile):
    """Pick a batch tile: multiple of 8 (or the full extent), capped at batch_tile,
    and — when the batch is mid-sized — split into >=2 grid steps so both v7x
    TensorCores get work."""
    if B < 16:
        # Can't split into >=2 blocks that are multiples of 8; use the full extent
        # (block == full array dim is always legal regardless of the (8,128) rule).
        return B
    if B <= 2 * batch_tile:
        # Guarantee at least 2 grid steps: ~half the batch, rounded down to a
        # multiple of 8 (min 8). Neutral on v5e/v6e, up to ~2x on v7x.
        tb = max(8, ((B // 2) // 8) * 8)
        return min(tb, batch_tile)
    return batch_tile


def generator_adv_forward(x, perturbation, eps=EPS, batch_tile=512):
    """x: (B, C, H, W) float32, perturbation: (1, C, H, W) float32."""
    B, C, H, W = x.shape
    assert perturbation.shape == (1, C, H, W)

    D = C * H * W  # 3 * 32 * 32 = 3072 = 24 * 128 -> lane-dense last dim

    # Flatten to a lane-dense 2D layout (layout plumbing only, no extra compute).
    x2 = x.reshape(B, D)
    p2 = perturbation.reshape(1, D)

    tb = _pick_batch_tile(B, batch_tile)
    grid = (pl.cdiv(B, tb),)
    kernel = functools.partial(_adv_kernel, eps=eps)

    out2 = pl.pallas_call(
        kernel,
        out_shape=jax.ShapeDtypeStruct((B, D), x.dtype),
        grid_spec=pltpu.PrefetchScalarGridSpec(
            num_scalar_prefetch=0,
            grid=grid,
            in_specs=[
                # one large lane-dense batch tile per grid step
                pl.BlockSpec((tb, D), lambda b: (b, 0)),
                # perturbation: constant block index -> not re-DMA'd each step
                pl.BlockSpec((1, D), lambda b: (0, 0)),
            ],
            out_specs=pl.BlockSpec((tb, D), lambda b: (b, 0)),
        ),
        compiler_params=pltpu.CompilerParams(
            # parallel batch axis: lets v7x shard the grid steps across its 2 TCs
            # (grid is guaranteed >=2 steps for B >= 16); neutral on v5e/v6e.
            dimension_semantics=("parallel",),
            # tb=512 uses ~24 MiB (double-buffered x + out tiles); 32 MiB is safe
            # on all generations (v5e/v6e 128 MiB physical, v7x 64 MiB physical)
            # and required on v5e whose scoped default is only 16 MiB.
            vmem_limit_bytes=32 * 1024 * 1024,
        ),
    )(x2, p2)

    return out2.reshape(B, C, H, W)


if __name__ == "__main__":
    key = jax.random.PRNGKey(0)
    k_x, k_p, k_x2 = jax.random.split(key, 3)

    # shapes implied by the module: input (B, 3, 32, 32), perturbation (1, 3, 32, 32)
    B, C, H, W = 2, 3, 32, 32
    x = jax.random.normal(k_x, (B, C, H, W), dtype=jnp.float32)
    # deterministic "parameter" init (mirrors torch.randn(size=(1, 3, 32, 32)))
    perturbation = jax.random.normal(k_p, (1, C, H, W), dtype=jnp.float32)

    out = generator_adv_forward(x, perturbation, EPS)
    out = jax.block_until_ready(out)
    ref = x + perturbation * EPS
    assert out.shape == (B, C, H, W)
    assert jnp.allclose(out, ref, atol=1e-6), "mismatch vs reference (B=2)"

    # exercise the multi-step / partial-last-block path (B not a multiple of tb)
    B2 = 20
    x_big = jax.random.normal(k_x2, (B2, C, H, W), dtype=jnp.float32)
    out_big = jax.block_until_ready(generator_adv_forward(x_big, perturbation, EPS))
    ref_big = x_big + perturbation * EPS
    assert out_big.shape == (B2, C, H, W)
    assert jnp.allclose(out_big, ref_big, atol=1e-6), "mismatch vs reference (B=20)"

    print("KERNEL_OK")
</pallas_src>

<mosaic_0001>
module attributes {stable_mosaic.version = 11 : i64} {
  func.func @_adv_kernel(%arg0: i32, %arg1: memref<2x3072xf32, #tpu.memory_space<vmem>>, %arg2: memref<1x3072xf32, #tpu.memory_space<vmem>>, %arg3: memref<2x3072xf32, #tpu.memory_space<vmem>>) attributes {dimension_semantics = [#tpu.dimension_semantics<parallel>], iteration_bounds = array<i64: 1>, scalar_prefetch = 0 : i64, scratch_operands = 0 : i64, tpu.core_type = #tpu.core_type<tc>, window_params = [{transform_indices = @transform_0, window_bounds = array<i64: 2, 3072>}, {pipeline_mode = #tpu.pipeline_mode<synchronous>, transform_indices = @transform_1, window_bounds = array<i64: 1, 3072>}, {transform_indices = @transform_2, window_bounds = array<i64: 2, 3072>}]} {
    %c0 = arith.constant 0 : index
    %c0_0 = arith.constant 0 : index
    %0 = vector.load %arg1[%c0, %c0_0] : memref<2x3072xf32, #tpu.memory_space<vmem>>, vector<2x3072xf32>
    %c0_1 = arith.constant 0 : index
    %c0_2 = arith.constant 0 : index
    %1 = vector.load %arg2[%c0_1, %c0_2] : memref<1x3072xf32, #tpu.memory_space<vmem>>, vector<1x3072xf32>
    %cst = arith.constant 0.0313725509 : f32
    %2 = vector.broadcast %cst : f32 to vector<1x3072xf32>
    %3 = arith.mulf %1, %2 : vector<1x3072xf32>
    %4 = vector.broadcast %3 : vector<1x3072xf32> to vector<2x3072xf32>
    %5 = arith.addf %0, %4 : vector<2x3072xf32>
    %c0_3 = arith.constant 0 : index
    %c0_4 = arith.constant 0 : index
    %6 = vector.load %arg3[%c0_3, %c0_4] : memref<2x3072xf32, #tpu.memory_space<vmem>>, vector<2x3072xf32>
    tpu.vector_store %arg3[%c0_3, %c0_4], %5 {strides = array<i32>} : memref<2x3072xf32, #tpu.memory_space<vmem>>, vector<2x3072xf32>,
    return
  }
  func.func @transform_0(%arg0: i32) -> (i32, i32) {
    %c0_i32 = arith.constant 0 : i32
    %c0_i32_0 = arith.constant 0 : i32
    return %arg0, %c0_i32 : i32, i32
  }
  func.func @transform_1(%arg0: i32) -> (i32, i32) {
    %c0_i32 = arith.constant 0 : i32
    %c0_i32_0 = arith.constant 0 : i32
    %c0_i32_1 = arith.constant 0 : i32
    return %c0_i32, %c0_i32_0 : i32, i32
  }
  func.func @transform_2(%arg0: i32) -> (i32, i32) {
    %c0_i32 = arith.constant 0 : i32
    %c0_i32_0 = arith.constant 0 : i32
    return %arg0, %c0_i32 : i32, i32
  }
}

</mosaic_0001>

<bundles_post_ra>
// kernel: tpu_custom_call.1
= control target key start
LH: loop header
LB: loop body
LE: loop exit
PB: predicated region body
PF: predicated region fallthrough
CT: control target
= control target key end

     0   :  { %7 = vsyncpa [#allocation3], 0  ;;  %s435_s0 = inlined_call_operand.hbm [shape: f32[2,3072], index: 0, kind: input, shape index: {}]   ;;  %s436_s1 = inlined_call_operand.hbm [shape: f32[1,3072], index: 1, kind: input, shape index: {}]   ;;  %s437_s2 = inlined_call_operand.hbm [shape: f32[2,3072], index: 2, kind: output, shape index: {}]  }
   0x1   :  { %8 = vsyncpa [#allocation6], 0 }
   0x2   :  { %9 = vsyncpa [#allocation4], 0  ;;  %s353_s9 = smov [#allocation2]   ;;  %s354_s11 = smov [#allocation5]  }
   0x3   :  { %s16_s10 = sshll.u32 %s353_s9, 4  ;;  %s26_s12 = sshll.u32 %s354_s11, 4  ;;  %s17_s10 = int_to_ptr.vmem [resolvable:$true] %s16_s10  ;;  %s27_s12 = int_to_ptr.vmem [resolvable:$true] %s26_s12 }
   0x4   :  { %s295_s13 = scalar_lea.vmem %s17_s10, 768  ;;  %p300_p1 = scmp.lt.s32.totalorder %s17_s10, %s17_s10 }
   0x5   :  { %p296_p0 = scmp.ne.s32.totalorder %s17_s10, %s295_s13  ;;  %p301_p2 = scmp.lt.s32.totalorder %s295_s13, %s295_s13 }
   0x7   :  { %p302_p3 = por %p301_p2, %p300_p1 }
   0x9   :  { %p303_p4 = pnand %p302_p3, %p296_p0 }
   0xb   :  { %306 = shalt.err (!%p303_p4)
}
   0xc   :  { %19 = dma.hbm_to_vmem [thread:$0]  %s435_s0, 768, %s17_s10, [#allocation3]  }
   0xd   :  { %s315_s16 = scalar_lea.vmem %s27_s12, 384  ;;  %p320_p6 = scmp.lt.s32.totalorder %s27_s12, %s27_s12 }
   0xe   :  { %p316_p5 = scmp.ne.s32.totalorder %s27_s12, %s315_s16  ;;  %p321_p7 = scmp.lt.s32.totalorder %s315_s16, %s315_s16 }
  0x10   :  { %p322_p8 = por %p321_p7, %p320_p6 }
  0x12   :  { %p323_p9 = pnand %p322_p8, %p316_p5 }
  0x14   :  { %326 = shalt.err (!%p323_p9)
}
  0x15   :  { %29 = dma.hbm_to_vmem [thread:$0]  %s436_s1, 384, %s27_s12, [#allocation6]  }
  0x16   :  { %347 = dma.done.wait [#allocation3], 768  }
  0x17   :  { %348 = vsyncadd [#allocation3], 4294966528 }
  0x18   :  { %349 = dma.done.wait [#allocation6], 384  }
  0x19   :  { %350 = vsyncadd [#allocation6], 4294966912  ;;  %v51_v0 = vlaneseq  ;;  %v355_v1 = vmov 1983009808   ;;  %v42_v9 = vld [vmem:[#allocation5] sm:$0xff]  ;;  %v43_v15 = vld [vmem:[#allocation5 + $0x8] sm:$0xff] }
  0x1a   :  { %v150_v2 = vunpack.c.l.s4 %v355_v1  ;;  %v45_v14 = vmul.f32 0.03137255, %v42_v9  ;;  %v46_v17 = vmul.f32 0.03137255, %v43_v15  ;;  %v44_v38 = vld [vmem:[#allocation5 + $0x10] sm:$0xff]  ;;  %v37_v45 = vld [vmem:[#allocation2 + $0x8] sm:$0xff] }
  0x1b   :  { %v52_v3 = vshrl.u32 %v51_v0, 7  ;;  %v36_v39 = vld [vmem:[#allocation2] sm:$0xff]  ;;  %v47_v52 = vmul.f32 0.03137255, %v44_v38  ;;  %v38_v54 = vld [vmem:[#allocation2 + $0x10] sm:$0xff]  ;;  %v39_v1 = vld [vmem:[#allocation2 + $0x18] sm:$0xff] }
  0x1c   :  { %v151_v4 = vunpack.c.0.s8 %v150_v2  ;;  %s356_s0 = smov [#allocation7]  }
  0x1d   :  { %v378_v5 = vsub.s32 0, %v52_v3  ;;  %v380_v6 = vsub.s32 1, %v52_v3  ;;  %v382_v7 = vsub.s32 2, %v52_v3  ;;  %v384_v8 = vsub.s32 3, %v52_v3  ;;  %s273_s1 = sshll.u32 %s356_s0, 4  ;;  %s274_s1 = int_to_ptr.vmem [resolvable:$true] %s273_s1 }
  0x1e   :  { %v386_v10 = vsub.s32 4, %v52_v3  ;;  %v388_v11 = vsub.s32 5, %v52_v3  ;;  %v390_v12 = vsub.s32 6, %v52_v3  ;;  %v392_v13 = vsub.s32 7, %v52_v3  ;;  %s327_s19 = scalar_lea.vmem %s274_s1, 768  ;;  %p332_p11 = scmp.lt.s32.totalorder %s274_s1, %s274_s1 }
  0x1f   :  { %v394_v16 = vsub.s32 %v151_v4, %v52_v3  ;;  %v54_v18 = vrot.slane %v45_v14, %v378_v5  ;;  %v58_v19 = vrot.slane %v45_v14, %v380_v6  ;;  %v62_v20 = vrot.slane %v45_v14, %v382_v7  ;;  %p328_p10 = scmp.ne.s32.totalorder %s274_s1, %s327_s19  ;;  %p333_p12 = scmp.lt.s32.totalorder %s327_s19, %s327_s19 }
  0x20   :  { %v66_v21 = vrot.slane %v45_v14, %v384_v8  ;;  %v70_v22 = vrot.slane %v45_v14, %v386_v10  ;;  %v74_v23 = vrot.slane %v45_v14, %v388_v11  ;;  %v78_v24 = vrot.slane %v45_v14, %v390_v12 }
  0x21   :  { %v82_v25 = vrot.slane %v45_v14, %v392_v13  ;;  %v147_v26 = vcombine.low %v54_v18, %v58_v19  ;;  %v86_v28 = vrot.slane %v46_v17, %v378_v5  ;;  %v90_v29 = vrot.slane %v46_v17, %v380_v6  ;;  %v40_v19 = vld [vmem:[#allocation2 + $0x20] sm:$0xff]  ;;  %p334_p13 = por %p333_p12, %p332_p11 }
  0x22   :  { %v148_v27 = vcombine.low %v62_v20, %v66_v21  ;;  %v164_v30 = vcombine.low %v70_v22, %v74_v23  ;;  %v94_v32 = vrot.slane %v46_v17, %v382_v7  ;;  %v98_v33 = vrot.slane %v46_v17, %v384_v8  ;;  %v41_v20 = vld [vmem:[#allocation2 + $0x28] sm:$0xff] }
  0x23   :  { %v165_v31 = vcombine.low %v78_v24, %v82_v25  ;;  %v155_v34 = vrot.slane %v147_v26, %v394_v16  ;;  %v181_v36 = vcombine.low %v86_v28, %v90_v29  ;;  %v102_v37 = vrot.slane %v46_v17, %v386_v10  ;;  %p335_p0 = pnand %p334_p13, %p328_p10 }
  0x24   :  { %v162_v35 = vrot.slane %v148_v27, %v394_v16  ;;  %v172_v40 = vrot.slane %v164_v30, %v394_v16  ;;  %v182_v42 = vcombine.low %v94_v32, %v98_v33  ;;  %v106_v43 = vrot.slane %v46_v17, %v388_v11 }
  0x25   :  { %v179_v41 = vrot.slane %v165_v31, %v394_v16  ;;  %v189_v46 = vrot.slane %v181_v36, %v394_v16  ;;  %v110_v47 = vrot.slane %v46_v17, %v390_v12  ;;  %v114_v48 = vrot.slane %v46_v17, %v392_v13 }
  0x26   :  { %v163_v44 = vcombine.low %v155_v34, %v162_v35  ;;  %v196_v50 = vrot.slane %v182_v42, %v394_v16  ;;  %v198_v51 = vcombine.low %v102_v37, %v106_v43  ;;  %v118_v59 = vrot.slane %v47_v52, %v378_v5 }
  0x27   :  { %v180_v49 = vcombine.low %v172_v40, %v179_v41  ;;  %v199_v55 = vcombine.low %v110_v47, %v114_v48  ;;  %v122_v61 = vrot.slane %v47_v52, %v380_v6  ;;  %v126_v62 = vrot.slane %v47_v52, %v382_v7 }
  0x28   :  { %v255_v53 = vadd.f32 %v163_v44, %v36_v39  ;;  %v197_v57 = vcombine.low %v189_v46, %v196_v50  ;;  %v206_v58 = vrot.slane %v198_v51, %v394_v16  ;;  %v130_v63 = vrot.slane %v47_v52, %v384_v8 }
  0x29   :  { %v256_v56 = vadd.f32 %v180_v49, %v37_v45  ;;  %v213_v60 = vrot.slane %v199_v55, %v394_v16  ;;  %v134_v2 = vrot.slane %v47_v52, %v386_v10  ;;  %v138_v3 = vrot.slane %v47_v52, %v388_v11 }
  0x2a   :  { %261 = vst [vmem:[#allocation7] sm:$0xff] %v255_v53  ;;  %v257_v0 = vadd.f32 %v197_v57, %v38_v54  ;;  %v142_v4 = vrot.slane %v47_v52, %v390_v12  ;;  %v215_v5 = vcombine.low %v118_v59, %v122_v61  ;;  %v216_v14 = vcombine.low %v126_v62, %v130_v63 }
  0x2b   :  { %262 = vst [vmem:[#allocation7 + $0x8] sm:$0xff] %v256_v56  ;;  %v214_v9 = vcombine.low %v206_v58, %v213_v60  ;;  %v146_v15 = vrot.slane %v47_v52, %v392_v13  ;;  %v232_v6 = vcombine.low %v134_v2, %v138_v3 }
  0x2c   :  { %263 = vst [vmem:[#allocation7 + $0x10] sm:$0xff] %v257_v0  ;;  %v223_v7 = vrot.slane %v215_v5, %v394_v16  ;;  %v230_v8 = vrot.slane %v216_v14, %v394_v16 }
  0x2d   :  { %v258_v17 = vadd.f32 %v214_v9, %v39_v1  ;;  %v233_v18 = vcombine.low %v142_v4, %v146_v15  ;;  %v240_v10 = vrot.slane %v232_v6, %v394_v16 }
  0x2e   :  { %v231_v11 = vcombine.low %v223_v7, %v230_v8 }
  0x2f   :  { %264 = vst [vmem:[#allocation7 + $0x18] sm:$0xff] %v258_v17  ;;  %v247_v12 = vrot.slane %v233_v18, %v394_v16 }
  0x30   :  { %v259_v21 = vadd.f32 %v231_v11, %v40_v19 }
  0x31   :  { %v248_v13 = vcombine.low %v240_v10, %v247_v12 }
  0x32   :  { %265 = vst [vmem:[#allocation7 + $0x20] sm:$0xff] %v259_v21 }
  0x33   :  { %v260_v22 = vadd.f32 %v248_v13, %v41_v20 }
  0x35   :  { %266 = vst [vmem:[#allocation7 + $0x28] sm:$0xff] %v260_v22 }
  0x36   :  { %338 = shalt.err (!%p335_p0)
}
  0x37   :  { %276 = dma.vmem_to_hbm [thread:$0]  %s274_s1, 768, %s437_s2, [#allocation4]  }
  0x38   :  { %351 = dma.done.wait [#allocation4], 768  }
  0x39   :  { %352 = vsyncadd [#allocation4], 4294966528 }
  0x3a   :  { %280 = vsyncpa [#allocation3], 1 }
  0x3b   :  { %281 = vsyncpa [#allocation6], 1 }
  0x3c   :  { %282 = vsyncpa [#allocation4], 1 }

</bundles_post_ra>
